<compile_context>
chip_gen: v6e
topology: v6e:2x2x1
jax: 0.10.0
libtpu: 0.0.40
codegen_flags: <defaults>
</compile_context>

<pallas_src>
import jax
import jax.numpy as jnp
import numpy as np
from jax.experimental import pallas as pl
from jax.experimental.pallas import tpu as pltpu

# ---------------- config (mirrors the PyTorch `config` dict) ----------------
CONFIG = dict(
    embed_dim=32,
    enc_hid_dim=32,
    dec_hid_dim=32,
    n_layers=1,       # dropout inactive when n_layers == 1
    dropout=0.0,
)
VOCAB_SIZE = 128      # lane-dense prediction (multiple of 128)
SRC_LEN = 8
BATCH = 8             # fills the 8 sublanes of each f32 vreg


# ------------------------------- Pallas kernel -------------------------------
def decoder_kernel(
    ids_ref,       # (B, 1) int32 token ids
    emb_ref,       # (V, E) embedding table
    hc_ref,        # (B, 2H) packed previous [h | c] (layer 0)
    enc_ref,       # (S, B, 2*EH) encoder outputs
    encp_ref,      # (S, B, H)  hoisted enc @ attn_we  (h-independent)
    attn_ref,      # (H+2, H)   rows: [attn_wh (H) | attn_b (1) | v (1)]
    w_ref,         # (E+2EH+H, 4H+V) fused [LSTM | fc(emb,ctx)] weight, rows [emb|ctx|h]
    b_ref,         # (1, 4H+V)       [b_ih + b_hh | fc_b]
    fc_wh_ref,     # (H, V)          fc weight rows for h_new
    pred_ref,      # out: (B, V)
    hc_out_ref,    # out: (B, 2H) packed new [h | c]  (aliased onto hc_ref's buffer)
    x_ref,         # scratch: (B, E+2EH+H) shared lane-aligned input slab
):
    B = ids_ref.shape[0]
    V, E = emb_ref.shape
    S = enc_ref.shape[0]
    EH2 = enc_ref.shape[2]
    H = encp_ref.shape[2]
    G = 4 * H

    h_prev = hc_ref[:, 0:H]                                             # (B, H)
    c_prev = hc_ref[:, H:2 * H]                                         # (B, H)

    # --- embedding lookup as one-hot matmul (MXU; avoids dynamic sublane gather)
    # NOTE: assumes 0 <= ids < V (out-of-range ids would produce a zero embedding).
    ids = ids_ref[...]                                                  # (B, 1)
    onehot = (jax.lax.broadcasted_iota(jnp.int32, (B, V), 1) == ids).astype(jnp.float32)
    embedded = jnp.dot(onehot, emb_ref[...],
                       preferred_element_type=jnp.float32)              # (B, E)

    # ----------------- attention (encoder projection hoisted) -----------------
    hproj = jnp.dot(h_prev, attn_ref[0:H, :],
                    preferred_element_type=jnp.float32) + attn_ref[H:H + 1, :]  # (B, H)
    energy = jnp.tanh(encp_ref[...] + hproj[None, :, :])                # (S, B, H)

    # score as VPU multiply + lane reduce; keepdims keeps a (S,B,1) layout so the
    # later broadcast against enc stays off the XLU relayout path.
    v_row = attn_ref[H + 1:H + 2, :]                                    # (1, H)
    score = jnp.sum(energy * v_row[None, :, :], axis=-1, keepdims=True) # (S, B, 1)

    # softmax over the sequence axis (dim 0), as in the PyTorch module
    m = jnp.max(score, axis=0, keepdims=True)
    e = jnp.exp(score - m)
    denom = jnp.sum(e, axis=0, keepdims=True)
    r = pl.reciprocal(denom, approx=True)        # EUP slot (no divide)
    r = r * (2.0 - denom * r)                    # one Newton step -> ~f32-exact
    attn = e * r                                                        # (S, B, 1)

    # context[b, :] = sum_s attn[s, b] * enc[s, b, :]
    context = jnp.sum(attn * enc_ref[...], axis=0)                      # (B, 2EH)

    # ---- shared (B, 128) input slab at fixed lane offsets: [emb | ctx | h_prev] ----
    x_ref[:, 0:E] = embedded
    x_ref[:, E:E + EH2] = context
    x_ref[:, E + EH2:E + EH2 + H] = h_prev

    # ---- ONE fused 128-deep MXU contraction: LSTM gates + h-independent fc part ----
    fused = jnp.dot(x_ref[...], w_ref[...],
                    preferred_element_type=jnp.float32) + b_ref[...]    # (B, 4H+V)
    gates = fused[:, 0:G]
    pred_base = fused[:, G:G + V]        # fc(emb, ctx) + fc_b  (h rows zeroed host-side)

    i_g = jax.nn.sigmoid(gates[:, 0 * H:1 * H])
    f_g = jax.nn.sigmoid(gates[:, 1 * H:2 * H])
    g_g = jnp.tanh(gates[:, 2 * H:3 * H])
    o_g = jax.nn.sigmoid(gates[:, 3 * H:4 * H])
    c_new = f_g * c_prev + i_g * g_g
    h_new = o_g * jnp.tanh(c_new)

    # fc head: only the h_new contribution sits on the post-LSTM critical path;
    # no slab overwrite / reload.
    pred_ref[...] = pred_base + jnp.dot(h_new, fc_wh_ref[...],
                                        preferred_element_type=jnp.float32)
    hc_out_ref[:, 0:H] = h_new
    hc_out_ref[:, H:2 * H] = c_new


# --------------------------- host-side weight packing -------------------------
def pack_kernel_params(params):
    E = CONFIG["embed_dim"]
    H = CONFIG["dec_hid_dim"]
    attn_w = params["attn_w"]          # (H + 2EH, H), rows [hidden | enc]
    fc_w = params["fc_w"]              # (H + E + 2EH, V), rows [h | emb | ctx]
    V = fc_w.shape[1]

    # fused LSTM weight, rows [emb | ctx | h]
    lstm_w = jnp.concatenate([params["w_ih"], params["w_hh"]], axis=0)          # (128, 4H)
    # fc weight for the h-independent part, rows [emb | ctx | zeros(h)]
    fc_ec = jnp.concatenate([fc_w[H:H + E], fc_w[H + E:],
                             jnp.zeros((H, V), jnp.float32)], axis=0)           # (128, V)
    big_w = jnp.concatenate([lstm_w, fc_ec], axis=1)                            # (128, 4H+V)
    big_b = jnp.concatenate([params["b_ih"] + params["b_hh"], params["fc_b"]],
                            axis=1)                                             # (1, 4H+V)
    attn_pack = jnp.concatenate([attn_w[:H], params["attn_b"], params["v_w"].T],
                                axis=0)                                         # (H+2, H)
    return dict(
        emb=params["emb"],
        attn_we=attn_w[H:],            # (2EH, H) — used for the hoisted enc projection
        attn_pack=attn_pack,
        big_w=big_w,
        big_b=big_b,
        fc_wh=fc_w[:H],                # (H, V)
    )


# ------------------------------- host wrapper --------------------------------
@jax.jit
def decoder_forward(params, input_ids, hidden, cell, encoder_outputs):
    L, B, H = hidden.shape
    assert L == 1, "kernel implements a single-layer LSTM (n_layers == 1)"
    S, _, EH2 = encoder_outputs.shape
    V, E = params["emb"].shape
    assert E + EH2 + H == 128, "input slab must be exactly 128 lanes deep"
    assert V % 128 == 0, "vocab size must be a multiple of 128 for lane-dense stores"

    kp = pack_kernel_params(params)

    # hoisted: encoder-side attention projection depends only on encoder_outputs
    enc_proj = jnp.einsum("sbe,eh->sbh", encoder_outputs, kp["attn_we"])    # (S, B, H)
    hc = jnp.concatenate([hidden[0], cell[0]], axis=1)                      # (B, 2H)

    # advisory scheduling hint for XLA
    flops = 2 * (B * V * E + B * H * H + S * B * H + S * B * EH2
                 + B * (E + EH2 + H) * (4 * H + V) + B * H * V)
    transcendentals = S * B * H + S * B + B + 5 * B * H
    bytes_accessed = 4 * (B + V * E + B * 2 * H + S * B * EH2 + S * B * H
                          + (H + 2) * H + (E + EH2 + H) * (4 * H + V) + (4 * H + V)
                          + H * V + B * V + B * 2 * H)

    vmem = pl.BlockSpec(memory_space=pltpu.MemorySpace.VMEM)
    out_shape = (
        jax.ShapeDtypeStruct((B, V), jnp.float32),          # prediction
        jax.ShapeDtypeStruct((B, 2 * H), jnp.float32),      # packed [h | c]
    )
    kernel = pl.pallas_call(
        decoder_kernel,
        out_shape=out_shape,
        in_specs=[vmem] * 9,
        out_specs=(vmem, vmem),
        scratch_shapes=[pltpu.VMEM((B, E + EH2 + H), jnp.float32)],
        input_output_aliases={2: 1},     # hc (input 2) updated in place as output 1
        cost_estimate=pl.CostEstimate(flops=flops,
                                      transcendentals=transcendentals,
                                      bytes_accessed=bytes_accessed),
    )
    pred, hc_new = kernel(
        input_ids.astype(jnp.int32).reshape(B, 1),
        kp["emb"],
        hc,
        encoder_outputs,
        enc_proj,
        kp["attn_pack"],
        kp["big_w"],
        kp["big_b"],
        kp["fc_wh"],
    )
    return pred, hc_new[:, :H][None], hc_new[:, H:][None]


# --------------------------- pure-JAX reference -------------------------------
def decoder_reference(params, input_ids, hidden, cell, encoder_outputs):
    embedded = params["emb"][input_ids]                               # (B, E)
    h_prev, c_prev = hidden[-1], cell[-1]                             # (B, H)
    S = encoder_outputs.shape[0]
    hid_rep = jnp.broadcast_to(h_prev[None], (S,) + h_prev.shape)
    cat = jnp.concatenate([hid_rep, encoder_outputs], axis=2)
    energy = jnp.tanh(cat @ params["attn_w"] + params["attn_b"])
    score = (energy @ params["v_w"])[..., 0]                          # (S, B)
    attn = jax.nn.softmax(score, axis=0)
    context = jnp.sum(attn[:, :, None] * encoder_outputs, axis=0)     # (B, 2EH)
    rnn_in = jnp.concatenate([embedded, context], axis=1)
    gates = rnn_in @ params["w_ih"] + params["b_ih"] + h_prev @ params["w_hh"] + params["b_hh"]
    H = h_prev.shape[1]
    i_g = jax.nn.sigmoid(gates[:, 0 * H:1 * H])
    f_g = jax.nn.sigmoid(gates[:, 1 * H:2 * H])
    g_g = jnp.tanh(gates[:, 2 * H:3 * H])
    o_g = jax.nn.sigmoid(gates[:, 3 * H:4 * H])
    c_new = f_g * c_prev + i_g * g_g
    h_new = o_g * jnp.tanh(c_new)
    out_cat = jnp.concatenate([h_new, embedded, context], axis=1)
    pred = out_cat @ params["fc_w"] + params["fc_b"]
    return pred, h_new[None], c_new[None]


# ------------------------------- param init -----------------------------------
def init_params(key):
    E = CONFIG["embed_dim"]
    EH = CONFIG["enc_hid_dim"]
    H = CONFIG["dec_hid_dim"]
    V = VOCAB_SIZE
    ks = jax.random.split(key, 10)

    def w(k, shape, scale=0.1):
        return (scale * jax.random.normal(k, shape)).astype(jnp.float32)

    return dict(
        emb=w(ks[0], (V, E)),
        attn_w=w(ks[1], (H + 2 * EH, H)),        # transposed nn.Linear weight, rows [hidden|enc]
        attn_b=w(ks[2], (1, H)),
        v_w=w(ks[3], (H, 1)),
        w_ih=w(ks[4], (E + 2 * EH, 4 * H)),      # transposed LSTM weight_ih, rows [emb|ctx]
        w_hh=w(ks[5], (H, 4 * H)),               # transposed LSTM weight_hh
        b_ih=w(ks[6], (1, 4 * H)),
        b_hh=w(ks[7], (1, 4 * H)),
        fc_w=w(ks[8], (H + E + 2 * EH, V)),      # transposed fc weight, rows [h|emb|ctx]
        fc_b=w(ks[9], (1, V)),
    )


if __name__ == "__main__":
    key = jax.random.PRNGKey(0)
    kp, k1, k2, k3, k4 = jax.random.split(key, 5)
    params = init_params(kp)

    EH = CONFIG["enc_hid_dim"]
    H = CONFIG["dec_hid_dim"]
    L = CONFIG["n_layers"]

    input_ids = jax.random.randint(k1, (BATCH,), 0, VOCAB_SIZE, dtype=jnp.int32)
    hidden = jax.random.normal(k2, (L, BATCH, H), dtype=jnp.float32)
    cell = jax.random.normal(k3, (L, BATCH, H), dtype=jnp.float32)
    encoder_outputs = jax.random.normal(k4, (SRC_LEN, BATCH, 2 * EH), dtype=jnp.float32)

    pred, h_new, c_new = decoder_forward(params, input_ids, hidden, cell, encoder_outputs)
    jax.block_until_ready((pred, h_new, c_new))

    ref_pred, ref_h, ref_c = decoder_reference(params, input_ids, hidden, cell, encoder_outputs)
    assert np.allclose(np.asarray(pred), np.asarray(ref_pred), atol=1e-4, rtol=1e-4)
    assert np.allclose(np.asarray(h_new), np.asarray(ref_h), atol=1e-4, rtol=1e-4)
    assert np.allclose(np.asarray(c_new), np.asarray(ref_c), atol=1e-4, rtol=1e-4)

    print("KERNEL_OK")
</pallas_src>

<mosaic_0001>
module attributes {stable_mosaic.version = 11 : i64} {
  func.func @decoder_kernel(%arg0: memref<8x1xi32, #tpu.memory_space<vmem>>, %arg1: memref<128x32xf32, #tpu.memory_space<vmem>>, %arg2: memref<8x64xf32, #tpu.memory_space<vmem>>, %arg3: memref<8x8x64xf32, #tpu.memory_space<vmem>>, %arg4: memref<8x8x32xf32, #tpu.memory_space<vmem>>, %arg5: memref<34x32xf32, #tpu.memory_space<vmem>>, %arg6: memref<128x256xf32, #tpu.memory_space<vmem>>, %arg7: memref<1x256xf32, #tpu.memory_space<vmem>>, %arg8: memref<32x128xf32, #tpu.memory_space<vmem>>, %arg9: memref<8x128xf32, #tpu.memory_space<vmem>>, %arg10: memref<8x64xf32, #tpu.memory_space<vmem>>, %arg11: memref<8x128xf32, #tpu.memory_space<vmem>>) attributes {dimension_semantics = [], scalar_prefetch = 0 : i64, scratch_operands = 1 : i64, tpu.core_type = #tpu.core_type<tc>} {
    %c0 = arith.constant 0 : index
    %c0_0 = arith.constant 0 : index
    %0 = vector.load %arg2[%c0, %c0_0] : memref<8x64xf32, #tpu.memory_space<vmem>>, vector<8x32xf32>
    %c0_1 = arith.constant 0 : index
    %c32 = arith.constant 32 : index
    %1 = vector.load %arg2[%c0_1, %c32] : memref<8x64xf32, #tpu.memory_space<vmem>>, vector<8x32xf32>
    %c0_2 = arith.constant 0 : index
    %c0_3 = arith.constant 0 : index
    %2 = vector.load %arg0[%c0_2, %c0_3] : memref<8x1xi32, #tpu.memory_space<vmem>>, vector<8x1xi32>
    %3 = tpu.iota {dimensions = array<i32: 1>} : vector<8x128xi32>
    %4 = vector.broadcast %2 : vector<8x1xi32> to vector<8x128xi32>
    %5 = arith.cmpi eq, %3, %4 : vector<8x128xi32>
    %6 = arith.extui %5 : vector<8x128xi1> to vector<8x128xi32>
    %7 = arith.sitofp %6 : vector<8x128xi32> to vector<8x128xf32>
    %c0_4 = arith.constant 0 : index
    %c0_5 = arith.constant 0 : index
    %8 = vector.load %arg1[%c0_4, %c0_5] : memref<128x32xf32, #tpu.memory_space<vmem>>, vector<128x32xf32>
    %cst = arith.constant dense<0.000000e+00> : vector<8x32xf32>
    %9 = tpu.matmul %7, %8, %cst {dimension_numbers = #tpu.dot_dimension_numbers<[1], [0], [0], [1], [0, 0, 1, 1], [], []>} : vector<8x128xf32>, vector<128x32xf32>, vector<8x32xf32> -> vector<8x32xf32>
    %c0_6 = arith.constant 0 : index
    %c0_7 = arith.constant 0 : index
    %10 = vector.load %arg5[%c0_6, %c0_7] : memref<34x32xf32, #tpu.memory_space<vmem>>, vector<32x32xf32>
    %cst_8 = arith.constant dense<0.000000e+00> : vector<8x32xf32>
    %11 = tpu.matmul %0, %10, %cst_8 {dimension_numbers = #tpu.dot_dimension_numbers<[1], [0], [0], [1], [0, 0, 1, 1], [], []>} : vector<8x32xf32>, vector<32x32xf32>, vector<8x32xf32> -> vector<8x32xf32>
    %c32_9 = arith.constant 32 : index
    %c0_10 = arith.constant 0 : index
    %12 = vector.load %arg5[%c32_9, %c0_10] : memref<34x32xf32, #tpu.memory_space<vmem>>, vector<1x32xf32>
    %13 = vector.broadcast %12 : vector<1x32xf32> to vector<8x32xf32>
    %14 = arith.addf %11, %13 : vector<8x32xf32>
    %c0_11 = arith.constant 0 : index
    %c0_12 = arith.constant 0 : index
    %c0_13 = arith.constant 0 : index
    %15 = vector.load %arg4[%c0_11, %c0_12, %c0_13] : memref<8x8x32xf32, #tpu.memory_space<vmem>>, vector<8x8x32xf32>
    %16 = vector.shape_cast %14 : vector<8x32xf32> to vector<1x8x32xf32>
    %17 = vector.broadcast %16 : vector<1x8x32xf32> to vector<8x8x32xf32>
    %18 = arith.addf %15, %17 : vector<8x8x32xf32>
    %19 = math.tanh %18 : vector<8x8x32xf32>
    %c33 = arith.constant 33 : index
    %c0_14 = arith.constant 0 : index
    %20 = vector.load %arg5[%c33, %c0_14] : memref<34x32xf32, #tpu.memory_space<vmem>>, vector<1x32xf32>
    %21 = vector.shape_cast %20 : vector<1x32xf32> to vector<1x1x32xf32>
    %22 = vector.broadcast %21 : vector<1x1x32xf32> to vector<8x8x32xf32>
    %23 = arith.mulf %19, %22 : vector<8x8x32xf32>
    %cst_15 = arith.constant dense<0.000000e+00> : vector<8x8xf32>
    %24 = vector.multi_reduction <add>, %23, %cst_15 [2] : vector<8x8x32xf32> to vector<8x8xf32>
    %25 = vector.shape_cast %24 : vector<8x8xf32> to vector<8x8x1xf32>
    %cst_16 = arith.constant dense<0xFF800000> : vector<8x1xf32>
    %26 = vector.multi_reduction <maximumf>, %25, %cst_16 [0] : vector<8x8x1xf32> to vector<8x1xf32>
    %27 = vector.shape_cast %26 : vector<8x1xf32> to vector<1x8x1xf32>
    %28 = vector.broadcast %27 : vector<1x8x1xf32> to vector<8x8x1xf32>
    %29 = arith.subf %25, %28 : vector<8x8x1xf32>
    %30 = math.exp %29 : vector<8x8x1xf32>
    %cst_17 = arith.constant dense<0.000000e+00> : vector<8x1xf32>
    %31 = vector.multi_reduction <add>, %30, %cst_17 [0] : vector<8x8x1xf32> to vector<8x1xf32>
    %32 = vector.shape_cast %31 : vector<8x1xf32> to vector<1x8x1xf32>
    %33 = tpu.reciprocal %32 {approx = true} : vector<1x8x1xf32> -> vector<1x8x1xf32>
    %34 = arith.mulf %32, %33 : vector<1x8x1xf32>
    %cst_18 = arith.constant 2.000000e+00 : f32
    %35 = vector.broadcast %cst_18 : f32 to vector<1x8x1xf32>
    %36 = arith.subf %35, %34 : vector<1x8x1xf32>
    %37 = arith.mulf %33, %36 : vector<1x8x1xf32>
    %38 = vector.broadcast %37 : vector<1x8x1xf32> to vector<8x8x1xf32>
    %39 = arith.mulf %30, %38 : vector<8x8x1xf32>
    %c0_19 = arith.constant 0 : index
    %c0_20 = arith.constant 0 : index
    %c0_21 = arith.constant 0 : index
    %40 = vector.load %arg3[%c0_19, %c0_20, %c0_21] : memref<8x8x64xf32, #tpu.memory_space<vmem>>, vector<8x8x64xf32>
    %41 = vector.broadcast %39 : vector<8x8x1xf32> to vector<8x8x64xf32>
    %42 = arith.mulf %41, %40 : vector<8x8x64xf32>
    %cst_22 = arith.constant dense<0.000000e+00> : vector<8x64xf32>
    %43 = vector.multi_reduction <add>, %42, %cst_22 [0] : vector<8x8x64xf32> to vector<8x64xf32>
    %c0_23 = arith.constant 0 : index
    %c0_24 = arith.constant 0 : index
    %44 = vector.load %arg11[%c0_23, %c0_24] : memref<8x128xf32, #tpu.memory_space<vmem>>, vector<8x32xf32>
    tpu.vector_store %arg11[%c0_23, %c0_24], %9 {strides = array<i32>} : memref<8x128xf32, #tpu.memory_space<vmem>>, vector<8x32xf32>,
    %c0_25 = arith.constant 0 : index
    %c32_26 = arith.constant 32 : index
    %45 = vector.load %arg11[%c0_25, %c32_26] : memref<8x128xf32, #tpu.memory_space<vmem>>, vector<8x64xf32>
    tpu.vector_store %arg11[%c0_25, %c32_26], %43 {strides = array<i32>} : memref<8x128xf32, #tpu.memory_space<vmem>>, vector<8x64xf32>,
    %c0_27 = arith.constant 0 : index
    %c96 = arith.constant 96 : index
    %46 = vector.load %arg11[%c0_27, %c96] : memref<8x128xf32, #tpu.memory_space<vmem>>, vector<8x32xf32>
    tpu.vector_store %arg11[%c0_27, %c96], %0 {strides = array<i32>} : memref<8x128xf32, #tpu.memory_space<vmem>>, vector<8x32xf32>,
    %c0_28 = arith.constant 0 : index
    %c0_29 = arith.constant 0 : index
    %47 = vector.load %arg11[%c0_28, %c0_29] : memref<8x128xf32, #tpu.memory_space<vmem>>, vector<8x128xf32>
    %c0_30 = arith.constant 0 : index
    %c0_31 = arith.constant 0 : index
    %48 = vector.load %arg6[%c0_30, %c0_31] : memref<128x256xf32, #tpu.memory_space<vmem>>, vector<128x256xf32>
    %cst_32 = arith.constant dense<0.000000e+00> : vector<8x256xf32>
    %49 = tpu.matmul %47, %48, %cst_32 {dimension_numbers = #tpu.dot_dimension_numbers<[1], [0], [0], [1], [0, 0, 1, 1], [], []>} : vector<8x128xf32>, vector<128x256xf32>, vector<8x256xf32> -> vector<8x256xf32>
    %c0_33 = arith.constant 0 : index
    %c0_34 = arith.constant 0 : index
    %50 = vector.load %arg7[%c0_33, %c0_34] : memref<1x256xf32, #tpu.memory_space<vmem>>, vector<1x256xf32>
    %51 = vector.broadcast %50 : vector<1x256xf32> to vector<8x256xf32>
    %52 = arith.addf %49, %51 : vector<8x256xf32>
    %53 = vector.extract_strided_slice %52 {offsets = [0, 0], sizes = [8, 128], strides = [1, 1]} : vector<8x256xf32> to vector<8x128xf32>
    %54 = vector.extract_strided_slice %52 {offsets = [0, 128], sizes = [8, 128], strides = [1, 1]} : vector<8x256xf32> to vector<8x128xf32>
    %55 = vector.extract_strided_slice %53 {offsets = [0, 0], sizes = [8, 32], strides = [1, 1]} : vector<8x128xf32> to vector<8x32xf32>
    %56 = arith.negf %55 : vector<8x32xf32>
    %57 = math.exp %56 : vector<8x32xf32>
    %cst_35 = arith.constant 1.000000e+00 : f32
    %58 = vector.broadcast %cst_35 : f32 to vector<8x32xf32>
    %59 = arith.addf %58, %57 : vector<8x32xf32>
    %60 = arith.divf %58, %59 : vector<8x32xf32>
    %61 = vector.extract_strided_slice %53 {offsets = [0, 32], sizes = [8, 32], strides = [1, 1]} : vector<8x128xf32> to vector<8x32xf32>
    %62 = arith.negf %61 : vector<8x32xf32>
    %63 = math.exp %62 : vector<8x32xf32>
    %cst_36 = arith.constant 1.000000e+00 : f32
    %64 = vector.broadcast %cst_36 : f32 to vector<8x32xf32>
    %65 = arith.addf %64, %63 : vector<8x32xf32>
    %66 = arith.divf %64, %65 : vector<8x32xf32>
    %67 = vector.extract_strided_slice %53 {offsets = [0, 64], sizes = [8, 32], strides = [1, 1]} : vector<8x128xf32> to vector<8x32xf32>
    %68 = math.tanh %67 : vector<8x32xf32>
    %69 = vector.extract_strided_slice %53 {offsets = [0, 96], sizes = [8, 32], strides = [1, 1]} : vector<8x128xf32> to vector<8x32xf32>
    %70 = arith.negf %69 : vector<8x32xf32>
    %71 = math.exp %70 : vector<8x32xf32>
    %cst_37 = arith.constant 1.000000e+00 : f32
    %72 = vector.broadcast %cst_37 : f32 to vector<8x32xf32>
    %73 = arith.addf %72, %71 : vector<8x32xf32>
    %74 = arith.divf %72, %73 : vector<8x32xf32>
    %75 = arith.mulf %66, %1 : vector<8x32xf32>
    %76 = arith.mulf %60, %68 : vector<8x32xf32>
    %77 = arith.addf %75, %76 : vector<8x32xf32>
    %78 = math.tanh %77 : vector<8x32xf32>
    %79 = arith.mulf %74, %78 : vector<8x32xf32>
    %c0_38 = arith.constant 0 : index
    %c0_39 = arith.constant 0 : index
    %80 = vector.load %arg8[%c0_38, %c0_39] : memref<32x128xf32, #tpu.memory_space<vmem>>, vector<32x128xf32>
    %cst_40 = arith.constant dense<0.000000e+00> : vector<8x128xf32>
    %81 = tpu.matmul %79, %80, %cst_40 {dimension_numbers = #tpu.dot_dimension_numbers<[1], [0], [0], [1], [0, 0, 1, 1], [], []>} : vector<8x32xf32>, vector<32x128xf32>, vector<8x128xf32> -> vector<8x128xf32>
    %82 = arith.addf %54, %81 : vector<8x128xf32>
    %c0_41 = arith.constant 0 : index
    %c0_42 = arith.constant 0 : index
    %83 = vector.load %arg9[%c0_41, %c0_42] : memref<8x128xf32, #tpu.memory_space<vmem>>, vector<8x128xf32>
    tpu.vector_store %arg9[%c0_41, %c0_42], %82 {strides = array<i32>} : memref<8x128xf32, #tpu.memory_space<vmem>>, vector<8x128xf32>,
    %c0_43 = arith.constant 0 : index
    %c0_44 = arith.constant 0 : index
    %84 = vector.load %arg10[%c0_43, %c0_44] : memref<8x64xf32, #tpu.memory_space<vmem>>, vector<8x32xf32>
    tpu.vector_store %arg10[%c0_43, %c0_44], %79 {strides = array<i32>} : memref<8x64xf32, #tpu.memory_space<vmem>>, vector<8x32xf32>,
    %c0_45 = arith.constant 0 : index
    %c32_46 = arith.constant 32 : index
    %85 = vector.load %arg10[%c0_45, %c32_46] : memref<8x64xf32, #tpu.memory_space<vmem>>, vector<8x32xf32>
    tpu.vector_store %arg10[%c0_45, %c32_46], %77 {strides = array<i32>} : memref<8x64xf32, #tpu.memory_space<vmem>>, vector<8x32xf32>,
    return
  }
}

</mosaic_0001>

<bundles_post_ra>
// kernel: decoder_forward.1
= control target key start
LH: loop header
LB: loop body
LE: loop exit
PB: predicated region body
PF: predicated region fallthrough
CT: control target
= control target key end

     0   :  { %v776_v1 = vmov 0.0   ;;  %vm777_vm0 = vmmov 0   ;;  %v778_v4 = vmov 0   ;;  %s1140_s0 = inlined_call_operand.vmem [shape: s32[8,1], index: 0, kind: input, shape index: {}]   ;;  %s1141_s1 = inlined_call_operand.vmem [shape: f32[128,32], index: 1, kind: input, shape index: {}]   ;;  %s1142_s2 = inlined_call_operand.vmem [shape: f32[8,64], index: 2, kind: input, shape index: {}, may-alias: {2,10}]   ;;  %s1143_s3 = inlined_call_operand.vmem [shape: f32[8,8,64], index: 3, kind: input, shape index: {}]   ;;  %s1144_s4 = inlined_call_operand.vmem [shape: f32[8,8,32], index: 4, kind: input, shape index: {}]   ;;  %s1145_s5 = inlined_call_operand.vmem [shape: f32[34,32], index: 5, kind: input, shape index: {}]   ;;  %s1146_s6 = inlined_call_operand.vmem [shape: f32[128,256], index: 6, kind: input, shape index: {}]   ;;  %s1147_s7 = inlined_call_operand.vmem [shape: f32[1,256], index: 7, kind: input, shape index: {}]   ;;  %s1148_s8 = inlined_call_operand.vmem [shape: f32[32,128], index: 8, kind: input, shape index: {}]   ;;  %s1149_s9 = inlined_call_operand.hbm [shape: f32[8,128], index: 9, kind: output, shape index: {0}]   ;;  %s1150_s10 = inlined_call_operand.vmem [shape: f32[8,64], index: 10, kind: output, shape index: {1}, may-alias: {2,10}]  }
   0x1   :  { %v134_v0 = vld [vmem:[%s1145_s5 + $0x18] sm:$0xff]  ;;  %681 = vmatprep.subr.mxu1 %v776_v1  ;;  %v133_v2 = vld [vmem:[%s1145_s5 + $0x10] sm:$0xff]  ;;  %689 = vmatprep.mubr.msk.f32.mxu1 %vm777_vm0, %v776_v1  ;;  %v36_v3 = vld [vmem:[%s1140_s0] sm:$0xff] }
   0x2   :  { %682 = vmatpush3.msra.mxu1 %v134_v0  ;;  %711 = vset.pattern.permute.xlu0 %v778_v4 }
   0x3   :  { %16 = vsyncpa [#allocation4], 0  ;;  %683 = vmatprep.subr.mxu1 %v776_v1  ;;  %v132_v5 = vld [vmem:[%s1145_s5 + $0x8] sm:$0xff]  ;;  %40 = vperm.xlu0 %711, %v36_v3   ;;  %v131_v6 = vld [vmem:[%s1145_s5] sm:$0xff]  ;;  %vm140_vm1 = vcmask 261120   ;;  %v37_v20 = vlaneseq  ;;  %v779_v27 = vmov 1.0  }
   0x4   :  { %684 = vmatpush3.msra.mxu1 %v133_v2  ;;  %646 = vmatprep.subr.mxu0 %v776_v1  ;;  %v865_v7 = vld [vmem:[%s1142_s2] sm:$0xff]  ;;  %v60_v8 = vld [vmem:[%s1141_s1 + $0x78] sm:$0xff]  ;;  %v59_v9 = vld [vmem:[%s1141_s1 + $0x70] sm:$0xff]  ;;  %s780_s14 = smov 96   ;;  %vm341_vm3 = vcmask 523264   ;;  %s781_s13 = smov 32  }
   0x5   :  { %685 = vmatprep.subr.mxu1 %v776_v1  ;;  %678 = vmatprep.mubr.msk.f32.mxu0 %vm777_vm0, %v776_v1  ;;  %v58_v10 = vld [vmem:[%s1141_s1 + $0x68] sm:$0xff]  ;;  %v57_v11 = vld [vmem:[%s1141_s1 + $0x60] sm:$0xff]  ;;  %v56_v12 = vld [vmem:[%s1141_s1 + $0x58] sm:$0xff]  ;;  %v38_v23 = vand.u32 127, %v37_v20  ;;  %vm362_vm4 = vcmask 785664   ;;  %vm367_vm5 = vcmask 1048320  }
   0x6   :  { %686 = vmatpush3.msra.mxu1 %v132_v5  ;;  %647 = vmatpush3.msra.mxu0 %v60_v8  ;;  %v55_v13 = vld [vmem:[%s1141_s1 + $0x50] sm:$0xff]  ;;  %v54_v14 = vld [vmem:[%s1141_s1 + $0x48] sm:$0xff]  ;;  %v53_v15 = vld [vmem:[%s1141_s1 + $0x40] sm:$0xff]  ;;  %s782_s15 = smov 64   ;;  %vm592_vm6 = vcmask 523520   ;;  %s783_s24 = smov [#allocation3]  }
   0x7   :  { %687 = vmatprep.subr.mxu1 %v776_v1  ;;  %648 = vmatprep.subr.mxu0 %v776_v1  ;;  %v52_v16 = vld [vmem:[%s1141_s1 + $0x38] sm:$0xff]  ;;  %v51_v17 = vld [vmem:[%s1141_s1 + $0x30] sm:$0xff]  ;;  %v50_v18 = vld [vmem:[%s1141_s1 + $0x28] sm:$0xff]  ;;  %s600_s25 = sshll.u32 %s783_s24, 4  ;;  %s601_s25 = int_to_ptr.vmem [resolvable:$true] %s600_s25 }
   0x8   :  { %688 = vmatpush3.msra.mxu1 %v131_v6  ;;  %649 = vmatpush3.msra.mxu0 %v59_v9  ;;  %v49_v19 = vld [vmem:[%s1141_s1 + $0x20] sm:$0xff]  ;;  %v48_v21 = vld [vmem:[%s1141_s1 + $0x18] sm:$0xff]  ;;  %v47_v22 = vld [vmem:[%s1141_s1 + $0x10] sm:$0xff]  ;;  %s754_s26 = scalar_lea.vmem %s601_s25, 128  ;;  %p759_p1 = scmp.lt.s32.totalorder %s601_s25, %s601_s25 }
   0x9   :  { %690 = vmatmul.mubr.msk.f32.vlgmr.msra.gmra.mxu1 %vm140_vm1, %v865_v7  ;;  %650 = vmatprep.subr.mxu0 %v776_v1  ;;  %v46_v24 = vld [vmem:[%s1141_s1 + $0x8] sm:$0xff]  ;;  %v45_v26 = vld [vmem:[%s1141_s1] sm:$0xff]  ;;  %v216_v32 = vld [vmem:[%s1144_s4 + $0x10] sm:$0xff]  ;;  %p755_p0 = scmp.ne.s32.totalorder %s601_s25, %s754_s26  ;;  %p760_p2 = scmp.lt.s32.totalorder %s754_s26, %s754_s26 }
   0xa   :  { %478 = vmatprep.mubr.f32.mxu1 %v776_v1  ;;  %651 = vmatpush3.msra.mxu0 %v58_v10  ;;  %v614_v28 = vld [vmem:[%s1145_s5 + $0x20] ss:$0 sm:$0xff]  ;;  %v215_v30 = vld [vmem:[%s1144_s4 + $0x8] sm:$0xff]  ;;  %v217_v35 = vld [vmem:[%s1144_s4 + $0x18] sm:$0xff] }
   0xb   :  { %652 = vmatprep.subr.mxu0 %v776_v1  ;;  %v214_v31 = vld [vmem:[%s1144_s4] sm:$0xff]  ;;  %v219_v42 = vld [vmem:[%s1144_s4 + $0x28] sm:$0xff]  ;;  %v220_v44 = vld [vmem:[%s1144_s4 + $0x30] sm:$0xff]  ;;  %p761_p3 = por %p760_p2, %p759_p1 }
   0xc   :  { %653 = vmatpush3.msra.mxu0 %v57_v11  ;;  %v218_v40 = vld [vmem:[%s1144_s4 + $0x20] sm:$0xff]  ;;  %v221_v48 = vld [vmem:[%s1144_s4 + $0x38] sm:$0xff] }
   0xd   :  { %654 = vmatprep.subr.mxu0 %v776_v1  ;;  %v616_v45 = vld [vmem:[%s1145_s5 + $0x21] ss:$0 sm:$0xff]  ;;  %v401_v11 = vld [vmem:[%s1146_s6 + $0xf8] sm:$0xff]  ;;  %p762_p4 = pnand %p761_p3, %p755_p0 }
   0xe   :  { %655 = vmatpush3.msra.mxu0 %v56_v12  ;;  %v400_v12 = vld [vmem:[%s1146_s6 + $0xf0] sm:$0xff]  ;;  %414 = vmatprep.subr.mxu1 %v401_v11 }
   0xf   :  { %656 = vmatprep.subr.mxu0 %v776_v1  ;;  %415 = vmatpush1.msra.mxu1 %v400_v12 }
  0x10   :  { %657 = vmatpush3.msra.mxu0 %v55_v13  ;;  %v399_v13 = vld [vmem:[%s1146_s6 + $0xe8] sm:$0xff] }
  0x11   :  { %658 = vmatprep.subr.mxu0 %v776_v1  ;;  %416 = vmatprep.subr.mxu1 %v399_v13 }
  0x12   :  { %659 = vmatpush3.msra.mxu0 %v54_v14  ;;  %v398_v14 = vld [vmem:[%s1146_s6 + $0xe0] sm:$0xff] }
  0x13   :  { %660 = vmatprep.subr.mxu0 %v776_v1  ;;  %417 = vmatpush1.msra.mxu1 %v398_v14 }
  0x14   :  { %661 = vmatpush3.msra.mxu0 %v53_v15  ;;  %v397_v15 = vld [vmem:[%s1146_s6 + $0xd8] sm:$0xff] }
  0x15   :  { %662 = vmatprep.subr.mxu0 %v776_v1  ;;  %418 = vmatprep.subr.mxu1 %v397_v15 }
  0x16   :  { %663 = vmatpush3.msra.mxu0 %v52_v16  ;;  %v396_v16 = vld [vmem:[%s1146_s6 + $0xd0] sm:$0xff] }
  0x17   :  { %664 = vmatprep.subr.mxu0 %v776_v1  ;;  %419 = vmatpush1.msra.mxu1 %v396_v16 }
  0x18   :  { %665 = vmatpush3.msra.mxu0 %v51_v17  ;;  %v395_v17 = vld [vmem:[%s1146_s6 + $0xc8] sm:$0xff] }
  0x19   :  { %666 = vmatprep.subr.mxu0 %v776_v1  ;;  %420 = vmatprep.subr.mxu1 %v395_v17 }
  0x1a   :  { %667 = vmatpush3.msra.mxu0 %v50_v18  ;;  %v394_v18 = vld [vmem:[%s1146_s6 + $0xc0] sm:$0xff] }
  0x1b   :  { %668 = vmatprep.subr.mxu0 %v776_v1  ;;  %421 = vmatpush1.msra.mxu1 %v394_v18 }
  0x1c   :  { %669 = vmatpush3.msra.mxu0 %v49_v19  ;;  %v393_v19 = vld [vmem:[%s1146_s6 + $0xb8] sm:$0xff] }
  0x1d   :  { %670 = vmatprep.subr.mxu0 %v776_v1  ;;  %422 = vmatprep.subr.mxu1 %v393_v19 }
  0x1e   :  { %671 = vmatpush3.msra.mxu0 %v48_v21  ;;  %v392_v21 = vld [vmem:[%s1146_s6 + $0xb0] sm:$0xff] }
  0x1f   :  { %672 = vmatprep.subr.mxu0 %v776_v1  ;;  %423 = vmatpush1.msra.mxu1 %v392_v21 }
  0x20   :  { %673 = vmatpush3.msra.mxu0 %v47_v22 }
  0x21   :  { %674 = vmatprep.subr.mxu0 %v776_v1 }
  0x22   :  { %675 = vmatpush3.msra.mxu0 %v46_v24  ;;  %v390_v24 = vld [vmem:[%s1146_s6 + $0xa0] sm:$0xff] }
  0x23   :  { %676 = vmatprep.subr.mxu0 %v776_v1 }
  0x24   :  { %677 = vmatpush3.msra.mxu0 %v45_v26  ;;  %v389_v26 = vld [vmem:[%s1146_s6 + $0x98] sm:$0xff] }
  0x25   :  { %692 = vmatprep.subr.mxu0 %v776_v1 }
  0x7e   :  { %v41_v25 = vpop.permute.xlu0 %40 }
  0x7f   :  { %vm42_vm2 = vcmp.eq.s32.totalorder %v38_v23, %v41_v25  ;;  %v391_v23 = vld [vmem:[%s1146_s6 + $0xa8] sm:$0xff] }
  0x80   :  { %679 = vmatmul.mubr.msk.f32.vlgmr.msra.gmra.mxu0 %vm42_vm2, %v779_v27  ;;  %424 = vmatprep.subr.mxu1 %v391_v23  ;;  %v388_v27 = vld [vmem:[%s1146_s6 + $0x90] sm:$0xff] }
  0x81   :  { %700 = vmatprep.mubr.msk.f32.mxu0 %vm777_vm0, %v776_v1  ;;  %425 = vmatpush1.msra.mxu1 %v390_v24 }
  0x82   :  { %426 = vmatprep.subr.mxu1 %v389_v26  ;;  %v325_v26 = vld [vmem:[%s1143_s3] sm:$0xff] }
  0x83   :  { %427 = vmatpush1.msra.mxu1 %v388_v27  ;;  %v326_v27 = vld [vmem:[%s1143_s3 + $0x8] sm:$0xff] }
  0xc9   :  { %v210_v29 = vpop.f32.mrf.mxu1 }
  0xca   :  { %v211_v33 = vadd.f32 %v614_v28, %v210_v29  ;;  %v387_v28 = vld [vmem:[%s1146_s6 + $0x88] sm:$0xff]  ;;  %v386_v29 = vld [vmem:[%s1146_s6 + $0x80] sm:$0xff] }
  0xcb   :  { %v691_v34 = vpop.f32.mrf.mxu1  ;;  %428 = vmatprep.subr.mxu1 %v387_v28  ;;  %v327_v28 = vld [vmem:[%s1143_s3 + $0x10] sm:$0xff] }
  0xcc   :  { %v223_v36 = vadd.f32 %v215_v30, %v211_v33  ;;  %v222_v37 = vadd.f32 %v214_v31, %v211_v33  ;;  %v224_v38 = vadd.f32 %v216_v32, %v211_v33  ;;  %v225_v39 = vadd.f32 %v217_v35, %v211_v33  ;;  %v385_v30 = vld [vmem:[%s1146_s6 + $0x78] sm:$0xff]  ;;  %v384_v31 = vld [vmem:[%s1146_s6 + $0x70] sm:$0xff]  ;;  %429 = vmatpush1.msra.mxu1 %v386_v29  ;;  %v383_v32 = vld [vmem:[%s1146_s6 + $0x68] sm:$0xff] }
  0xcd   :  { %v226_v41 = vadd.f32 %v218_v40, %v211_v33  ;;  %v227_v43 = vadd.f32 %v219_v42, %v211_v33  ;;  %v228_v46 = vadd.f32 %v220_v44, %v211_v33  ;;  %v229_v55 = vadd.f32 %v221_v48, %v211_v33  ;;  %430 = vmatprep.subr.mxu1 %v385_v30  ;;  %v382_v33 = vld [vmem:[%s1146_s6 + $0x60] sm:$0xff]  ;;  %v381_v34 = vld [vmem:[%s1146_s6 + $0x58] sm:$0xff]  ;;  %v380_v35 = vld [vmem:[%s1146_s6 + $0x50] sm:$0xff] }
  0xce   :  { %712 = vtanh.f32 %v223_v36  ;;  %431 = vmatpush1.msra.mxu1 %v384_v31  ;;  %v379_v36 = vld [vmem:[%s1146_s6 + $0x48] sm:$0xff] }
  0xcf   :  { %714 = vtanh.f32 %v222_v37  ;;  %432 = vmatprep.subr.mxu1 %v383_v32 }
  0xd0   :  { %716 = vtanh.f32 %v224_v38  ;;  %433 = vmatpush1.msra.mxu1 %v382_v33  ;;  %v328_v33 = vld [vmem:[%s1143_s3 + $0x18] sm:$0xff] }
  0xd1   :  { %718 = vtanh.f32 %v225_v39  ;;  %434 = vmatprep.subr.mxu1 %v381_v34 }
  0xd2   :  { %720 = vtanh.f32 %v226_v41  ;;  %435 = vmatpush1.msra.mxu1 %v380_v35 }
  0xd3   :  { %722 = vtanh.f32 %v227_v43  ;;  %436 = vmatprep.subr.mxu1 %v379_v36 }
  0xd4   :  { %724 = vtanh.f32 %v228_v46 }
  0xd5   :  { %726 = vtanh.f32 %v229_v55 }
  0xdb   :  { %v713_v47 = vpop.eup %712 }
  0xdc   :  { %v715_v49 = vpop.eup %714  ;;  %v244_v50 = vmul.f32 %v713_v47, %v616_v45 }
  0xdd   :  { %v717_v51 = vpop.eup %716  ;;  %v243_v52 = vmul.f32 %v715_v49, %v616_v45 }
  0xde   :  { %v254_v53 = vsel %vm140_vm1, %v244_v50, 0.0  ;;  %v245_v54 = vmul.f32 %v717_v51, %v616_v45  ;;  %v719_v56 = vpop.eup %718 }
  0xdf   :  { %255 = vadd.xlane.f32.xlu1 %v254_v53  ;;  %v251_v57 = vsel %vm140_vm1, %v243_v52, 0.0  ;;  %v246_v59 = vmul.f32 %v719_v56, %v616_v45  ;;  %v721_v60 = vpop.eup %720 }
  0xe0   :  { %252 = vadd.xlane.f32.xlu0 %v251_v57  ;;  %v257_v58 = vsel %vm140_vm1, %v245_v54, 0.0  ;;  %v247_v62 = vmul.f32 %v721_v60, %v616_v45  ;;  %v723_v63 = vpop.eup %722 }
  0xe1   :  { %v260_v61 = vsel %vm140_vm1, %v246_v59, 0.0  ;;  %v248_v2 = vmul.f32 %v723_v63, %v616_v45  ;;  %v725_v3 = vpop.eup %724 }
  0xe2   :  { %v263_v0 = vsel %vm140_vm1, %v247_v62, 0.0  ;;  %v249_v5 = vmul.f32 %v725_v3, %v616_v45  ;;  %v727_v6 = vpop.eup %726 }
  0xe3   :  { %258 = vadd.xlane.f32.xlu1 %v257_v58  ;;  %v266_v4 = vsel %vm140_vm1, %v248_v2, 0.0  ;;  %v250_v9 = vmul.f32 %v727_v6, %v616_v45 }
  0xe4   :  { %v269_v8 = vsel %vm140_vm1, %v249_v5, 0.0 }
  0xe5   :  { %v272_v10 = vsel %vm140_vm1, %v250_v9, 0.0 }
  0xe7   :  { %261 = vadd.xlane.f32.xlu1 %v260_v61 }
  0xeb   :  { %264 = vadd.xlane.f32.xlu1 %v263_v0 }
  0xef   :  { %267 = vadd.xlane.f32.xlu1 %v266_v4 }
  0xf3   :  { %270 = vadd.xlane.f32.xlu1 %v269_v8 }
  0xf6   :  { %364 = vrot.lane.b32.xlu0 %v865_v7, %s780_s14 }
  0xf7   :  { %273 = vadd.xlane.f32.xlu1 %v272_v10 }
 0x140   :  { %v127_v22 = vpop.f32.mrf.mxu0 }
 0x141   :  { %357 = vst.msk [vmem:[#allocation2] sm:$0xff] %vm140_vm1, %v127_v22 }
 0x142   :  { %v680_v25 = vpop.f32.mrf.mxu0 }
 0x168   :  { %v256_v37 = vpop.xlane.xlu1 %255 }
 0x169   :  { %v253_v44 = vpop.xlane.xlu0 %252 }
 0x16c   :  { %v259_v38 = vpop.xlane.xlu1 %258 }
 0x170   :  { %v262_v39 = vpop.xlane.xlu1 %261 }
 0x174   :  { %v265_v40 = vpop.xlane.xlu1 %264 }
 0x175   :  { %v275_v46 = vmax.f32 %v253_v44, %v265_v40 }
 0x178   :  { %v268_v41 = vpop.xlane.xlu1 %267 }
 0x179   :  { %v276_v43 = vmax.f32 %v256_v37, %v268_v41 }
 0x17b   :  { %v279_v49 = vmax.f32 %v275_v46, %v276_v43  ;;  %v330_v43 = vld [vmem:[%s1143_s3 + $0x28] sm:$0xff]  ;;  %v331_v46 = vld [vmem:[%s1143_s3 + $0x30] sm:$0xff] }
 0x17c   :  { %v271_v42 = vpop.xlane.xlu1 %270 }
 0x17d   :  { %v277_v47 = vmax.f32 %v259_v38, %v271_v42 }
 0x180   :  { %v274_v45 = vpop.xlane.xlu1 %273 }
 0x181   :  { %v278_v48 = vmax.f32 %v262_v39, %v274_v45 }
 0x183   :  { %v280_v50 = vmax.f32 %v277_v47, %v278_v48 }
 0x185   :  { %v281_v51 = vmax.f32 %v279_v49, %v280_v50  ;;  %v378_v49 = vld [vmem:[%s1146_s6 + $0x40] sm:$0xff] }
 0x186   :  { %437 = vmatpush1.msra.mxu1 %v378_v49 }
 0x187   :  { %v282_v52 = vsub.f32 %v253_v44, %v281_v51  ;;  %v283_v53 = vsub.f32 %v256_v37, %v281_v51  ;;  %v284_v54 = vsub.f32 %v259_v38, %v281_v51  ;;  %v285_v55 = vsub.f32 %v262_v39, %v281_v51  ;;  %v329_v38 = vld [vmem:[%s1143_s3 + $0x20] sm:$0xff] }
 0x188   :  { %v286_v58 = vsub.f32 %v265_v40, %v281_v51  ;;  %v287_v60 = vsub.f32 %v268_v41, %v281_v51  ;;  %v288_v62 = vsub.f32 %v271_v42, %v281_v51  ;;  %v289_v0 = vsub.f32 %v274_v45, %v281_v51  ;;  %v377_v51 = vld [vmem:[%s1146_s6 + $0x38] sm:$0xff] }
 0x189   :  { %v290_v56 = vmul.f32 1.442695, %v282_v52  ;;  %v292_v57 = vmul.f32 1.442695, %v283_v53  ;;  %v294_v59 = vmul.f32 1.442695, %v284_v54  ;;  %438 = vmatprep.subr.mxu1 %v377_v51 }
 0x18a   :  { %v296_v61 = vmul.f32 1.442695, %v285_v55  ;;  %v298_v63 = vmul.f32 1.442695, %v286_v58  ;;  %v300_v2 = vmul.f32 1.442695, %v287_v60 }
 0x18b   :  { %728 = vpow2.f32 %v290_v56  ;;  %v302_v3 = vmul.f32 1.442695, %v288_v62  ;;  %v304_v4 = vmul.f32 1.442695, %v289_v0  ;;  %v376_v52 = vld [vmem:[%s1146_s6 + $0x30] sm:$0xff]  ;;  %v375_v53 = vld [vmem:[%s1146_s6 + $0x28] sm:$0xff] }
 0x18c   :  { %730 = vpow2.f32 %v292_v57  ;;  %v374_v57 = vld [vmem:[%s1146_s6 + $0x20] sm:$0xff]  ;;  %v332_v58 = vld [vmem:[%s1143_s3 + $0x38] sm:$0xff]  ;;  %439 = vmatpush1.msra.mxu1 %v376_v52 }
 0x18d   :  { %732 = vpow2.f32 %v294_v59  ;;  %v373_v60 = vld [vmem:[%s1146_s6 + $0x18] sm:$0xff]  ;;  %440 = vmatprep.subr.mxu1 %v375_v53 }
 0x18e   :  { %734 = vpow2.f32 %v296_v61  ;;  %441 = vmatpush1.msra.mxu1 %v374_v57 }
 0x18f   :  { %736 = vpow2.f32 %v298_v63  ;;  %v372_v63 = vld [vmem:[%s1146_s6 + $0x10] sm:$0xff]  ;;  %442 = vmatprep.subr.mxu1 %v373_v60 }
 0x190   :  { %738 = vpow2.f32 %v300_v2  ;;  %v371_v2 = vld [vmem:[%s1146_s6 + $0x8] sm:$0xff]  ;;  %443 = vmatpush1.msra.mxu1 %v372_v63 }
 0x191   :  { %740 = vpow2.f32 %v302_v3  ;;  %444 = vmatprep.subr.mxu1 %v371_v2 }
 0x192   :  { %742 = vpow2.f32 %v304_v4 }
 0x198   :  { %v729_v5 = vpop.eup %728 }
 0x199   :  { %v731_v6 = vpop.eup %730 }
 0x19a   :  { %v306_v8 = vadd.f32 %v731_v6, %v729_v5  ;;  %v733_v9 = vpop.eup %732 }
 0x19b   :  { %v735_v11 = vpop.eup %734 }
 0x19c   :  { %v307_v10 = vadd.f32 %v733_v9, %v306_v8  ;;  %v737_v13 = vpop.eup %736 }
 0x19d   :  { %v739_v15 = vpop.eup %738 }
 0x19e   :  { %v308_v12 = vadd.f32 %v735_v11, %v307_v10  ;;  %v741_v17 = vpop.eup %740 }
 0x19f   :  { %v743_v19 = vpop.eup %742 }
 0x1a0   :  { %v309_v14 = vadd.f32 %v737_v13, %v308_v12  ;;  %v365_v12 = vpop.permute.xlu0 %364 }
 0x1a2   :  { %v310_v16 = vadd.f32 %v739_v15, %v309_v14 }
 0x1a4   :  { %v311_v18 = vadd.f32 %v741_v17, %v310_v16 }
 0x1a6   :  { %v312_v21 = vadd.f32 %v743_v19, %v311_v18 }
 0x1a8   :  { %744 = vrcp.f32 %v312_v21 }
 0x1b5   :  { %v745_v22 = vpop.eup %744 }
 0x1b6   :  { %v314_v23 = vmul.f32 %v745_v22, %v312_v21 }
 0x1b8   :  { %v315_v24 = vsub.f32 2.0, %v314_v23 }
 0x1ba   :  { %v316_v25 = vmul.f32 %v745_v22, %v315_v24 }
 0x1bc   :  { %v317_v29 = vmul.f32 %v729_v5, %v316_v25  ;;  %v318_v30 = vmul.f32 %v731_v6, %v316_v25  ;;  %v319_v31 = vmul.f32 %v733_v9, %v316_v25  ;;  %v320_v32 = vmul.f32 %v735_v11, %v316_v25  ;;  %v370_v5 = vld [vmem:[%s1146_s6] sm:$0xff] }
 0x1bd   :  { %v321_v34 = vmul.f32 %v737_v13, %v316_v25  ;;  %v322_v39 = vmul.f32 %v739_v15, %v316_v25  ;;  %v323_v45 = vmul.f32 %v741_v17, %v316_v25  ;;  %v324_v54 = vmul.f32 %v743_v19, %v316_v25  ;;  %445 = vmatpush1.msra.mxu1 %v370_v5  ;;  %v402_v17 = vld [vmem:[%s1147_s7] sm:$0x3] }
 0x1be   :  { %v333_v35 = vmul.f32 %v325_v26, %v317_v29  ;;  %v334_v36 = vmul.f32 %v326_v27, %v318_v30  ;;  %v335_v37 = vmul.f32 %v327_v28, %v319_v31  ;;  %v336_v40 = vmul.f32 %v328_v33, %v320_v32  ;;  %v512_v31 = vld [vmem:[%s1148_s8 + $0x18] sm:$0xff]  ;;  %v511_v32 = vld [vmem:[%s1148_s8 + $0x10] sm:$0xff]  ;;  %v510_v33 = vld [vmem:[%s1148_s8 + $0x8] sm:$0xff] }
 0x1bf   :  { %v337_v47 = vmul.f32 %v329_v38, %v321_v34  ;;  %v338_v55 = vmul.f32 %v330_v43, %v322_v39  ;;  %v339_v61 = vmul.f32 %v331_v46, %v323_v45  ;;  %v340_v3 = vmul.f32 %v332_v58, %v324_v54  ;;  %693 = vmatpush3.msra.mxu0 %v512_v31 }
 0x1c0   :  { %v342_v41 = vsel %vm341_vm3, %v333_v35, 0.0  ;;  %v343_v42 = vsel %vm341_vm3, %v334_v36, 0.0  ;;  %v345_v48 = vsel %vm341_vm3, %v335_v37, 0.0  ;;  %v347_v56 = vsel %vm341_vm3, %v336_v40, 0.0  ;;  %694 = vmatprep.subr.mxu0 %v776_v1 }
 0x1c1   :  { %v344_v44 = vadd.f32 %v343_v42, %v342_v41  ;;  %v349_v62 = vsel %vm341_vm3, %v337_v47, 0.0  ;;  %v351_v4 = vsel %vm341_vm3, %v338_v55, 0.0  ;;  %v353_v8 = vsel %vm341_vm3, %v339_v61, 0.0  ;;  %695 = vmatpush3.msra.mxu0 %v511_v32 }
 0x1c2   :  { %v355_v10 = vsel %vm341_vm3, %v340_v3, 0.0  ;;  %v405_v15 = vshrl.u32 %v37_v20, 7  ;;  %696 = vmatprep.subr.mxu0 %v776_v1 }
 0x1c3   :  { %v346_v50 = vadd.f32 %v345_v48, %v344_v44  ;;  %697 = vmatpush3.msra.mxu0 %v510_v33 }
 0x1c4   :  { %v406_v16 = vsub.s32 0, %v405_v15  ;;  %698 = vmatprep.subr.mxu0 %v776_v1  ;;  %v410_v1 = vsub.s32 1, %v405_v15 }
 0x1c5   :  { %v348_v59 = vadd.f32 %v347_v56, %v346_v50 }
 0x1c6   :  { %v407_v18 = vrot.slane %v402_v17, %v406_v16  ;;  %v411_v38 = vrot.slane %v402_v17, %v410_v1 }
 0x1c7   :  { %v350_v0 = vadd.f32 %v349_v62, %v348_v59 }
 0x1c9   :  { %v352_v6 = vadd.f32 %v351_v4, %v350_v0 }
 0x1cb   :  { %v354_v9 = vadd.f32 %v353_v8, %v352_v6 }
 0x1cd   :  { %v356_v11 = vadd.f32 %v355_v10, %v354_v9 }
 0x1cf   :  { %359 = vrot.lane.b32.xlu1 %v356_v11, %s781_s13 }
 0x241   :  { %v360_v13 = vpop.permute.xlu1 %359 }
 0x242   :  { %363 = vst.msk [vmem:[#allocation2] sm:$0xff] %vm362_vm4, %v360_v13 }
 0x243   :  { %368 = vst.msk [vmem:[#allocation2] sm:$0xff] %vm367_vm5, %v365_v12 }
 0x24a   :  { %v369_v14 = vld [vmem:[#allocation2] sm:$0xff] }
 0x24b   :  { %479 = vmatmul.mubr.f32.vlgmr.msra.gmra.mxu1 %v369_v14 }
 0x30b   :  { %v480_v19 = vpop.f32.mrf.mxu1 }
 0x30c   :  { %v481_v21 = vadd.f32 %v480_v19, %v407_v18 }
 0x30d   :  { %v482_v39 = vpop.f32.mrf.mxu1 }
 0x30e   :  { %746 = vtanh.f32 %v481_v21  ;;  %v617_v23 = vmul.f32 -1.442695, %v481_v21  ;;  %v483_v40 = vadd.f32 %v482_v39, %v411_v38 }
 0x310   :  { %748 = vpow2.f32 %v617_v23 }
 0x31b   :  { %v747_v22 = vpop.eup %746 }
 0x31c   :  { %494 = vrot.lane.b32.xlu1 %v747_v22, %s782_s15 }
 0x31d   :  { %v749_v24 = vpop.eup %748 }
 0x31e   :  { %v488_v25 = vadd.f32 1.0, %v749_v24 }
 0x320   :  { %750 = vrcp.f32 %v488_v25 }
 0x32d   :  { %v751_v26 = vpop.eup %750 }
 0x32e   :  { %v492_v28 = vmul.f32 %v751_v26, %v865_v7  ;;  %v509_v7 = vld [vmem:[%s1148_s8] sm:$0xff] }
 0x32f   :  { %699 = vmatpush3.msra.mxu0 %v509_v7 }
 0x38e   :  { %v495_v27 = vpop.permute.xlu1 %494 }
 0x38f   :  { %v497_v20 = vmul.f32 %v751_v26, %v495_v27 }
 0x391   :  { %499 = vrot.lane.b32.xlu1 %v497_v20, %s781_s13 }
 0x403   :  { %v500_v29 = vpop.permute.xlu1 %499 }
 0x404   :  { %v502_v30 = vadd.f32 %v500_v29, %v492_v28 }
 0x406   :  { %752 = vtanh.f32 %v502_v30 }
 0x413   :  { %v753_v34 = vpop.eup %752 }
 0x414   :  { %505 = vrot.lane.b32.xlu1 %v753_v34, %s782_s15 }
 0x486   :  { %v506_v35 = vpop.permute.xlu1 %505 }
 0x487   :  { %v508_v36 = vmul.f32 %v751_v26, %v506_v35 }
 0x489   :  { %514 = vrot.lane.b32.xlu0 %v508_v36, %s781_s13 }
 0x4fb   :  { %v515_v37 = vpop.permute.xlu0 %514 }
 0x4fc   :  { %591 = vst.msk [vmem:[%s1150_s10] sm:$0xff] %vm140_vm1, %v515_v37  ;;  %701 = vmatmul.mubr.msk.f32.vlgmr.msra.gmra.mxu0 %vm140_vm1, %v515_v37 }
 0x4fd   :  { %593 = vst.msk [vmem:[%s1150_s10] sm:$0xff] %vm592_vm6, %v502_v30 }
 0x5bc   :  { %v584_v41 = vpop.f32.mrf.mxu0 }
 0x5bd   :  { %v588_v42 = vadd.f32 %v584_v41, %v483_v40 }
 0x5be   :  { %v702_v43 = vpop.f32.mrf.mxu0 }
 0x5bf   :  { %589 = vst [vmem:[#allocation3] sm:$0xff] %v588_v42 }
 0x5c0   :  { %765 = shalt.err (!%p762_p4)
}
 0x5c1   :  { %603 = dma.vmem_to_hbm [thread:$0]  %s601_s25, 128, %s1149_s9, [#allocation4]  }
 0x5c2   :  { %774 = dma.done.wait [#allocation4], 128  }
 0x5c3   :  { %775 = vsyncadd [#allocation4], 4294967168 }
 0x5c4   :  { %611 = vsyncpa [#allocation4], 1 }

</bundles_post_ra>
